<compile_context>
chip_gen: v5e
topology: v5e:2x2
jax: 0.10.0
libtpu: 0.0.40
codegen_flags: <defaults>
</compile_context>

<pallas_src>
import functools

import jax
import jax.numpy as jnp
from jax.experimental import pallas as pl
from jax.experimental.pallas import tpu as pltpu


def _round_up(n, k):
    return ((n + k - 1) // k) * k


def _antideriv_tanh(z):
    a = jnp.abs(z)
    e = jnp.exp(-2.0 * a)          # argument <= 0 -> cannot overflow
    return a + jnp.log1p(e)


def _resnn_kernel(x_ref, w0t_ref, b0_ref, wrt_ref, br_ref, o_ref, *, n_res, h):
    # Opening layer: Linear(d+1, m) + act.  K = d+1 is tiny; kept as one dot.
    x = x_ref[...]                                       # (tile, d+1)
    u = jnp.dot(x, w0t_ref[...],
                preferred_element_type=jnp.float32) + b0_ref[...]
    u = _antideriv_tanh(u)                               # (tile, m)

    # Residual layers (static unroll, nTh is small): u = u + h * act(u @ Wi^T + bi)
    for i in range(n_res):
        z = jnp.dot(u, wrt_ref[i],
                    preferred_element_type=jnp.float32) + br_ref[i]
        u = u + h * _antideriv_tanh(z)

    o_ref[...] = u.astype(o_ref.dtype)


def resnn_forward(x, w0, b0, wr, br, nTh, tile_nex=2048):
    """x: (nex, d+1); w0: (m, d+1); b0: (m,); wr: (nTh-1, m, m); br: (nTh-1, m)."""
    nex, dp1 = x.shape
    m = w0.shape[0]
    n_res = nTh - 1
    h = 1.0 / n_res

    # Batch tile: multiple of 8 sublanes, capped for VMEM safety on all gens.
    tile = min(tile_nex, _round_up(nex, 8))
    nex_p = _round_up(nex, tile)

    x_p = x.astype(jnp.float32)
    if nex_p != nex:
        x_p = jnp.pad(x_p, ((0, nex_p - nex), (0, 0)))

    # Pre-transpose weights on the host so the kernel never transposes.
    w0t = jnp.asarray(w0, jnp.float32).T                      # (d+1, m)
    b0r = jnp.asarray(b0, jnp.float32).reshape(1, m)          # (1, m)
    wrt = jnp.transpose(jnp.asarray(wr, jnp.float32), (0, 2, 1))  # (n_res, m, m)
    brr = jnp.asarray(br, jnp.float32).reshape(n_res, 1, m)   # (n_res, 1, m)

    grid = (nex_p // tile,)

    flops = 2 * nex_p * (dp1 * m + n_res * m * m)
    transcendentals = 2 * nex_p * m * nTh                     # exp + log per elem/layer
    bytes_accessed = 4 * (nex_p * dp1 + nex_p * m
                          + dp1 * m + m + n_res * m * m + n_res * m)

    kernel = functools.partial(_resnn_kernel, n_res=n_res, h=h)
    out = pl.pallas_call(
        kernel,
        out_shape=jax.ShapeDtypeStruct((nex_p, m), jnp.float32),
        grid=grid,
        in_specs=[
            pl.BlockSpec((tile, dp1), lambda i: (i, 0)),          # x: tiled over batch
            pl.BlockSpec((dp1, m), lambda i: (0, 0)),             # W0^T: resident
            pl.BlockSpec((1, m), lambda i: (0, 0)),               # b0: resident
            pl.BlockSpec((n_res, m, m), lambda i: (0, 0, 0)),     # Wr^T: resident
            pl.BlockSpec((n_res, 1, m), lambda i: (0, 0, 0)),     # br: resident
        ],
        out_specs=pl.BlockSpec((tile, m), lambda i: (i, 0)),
        compiler_params=pltpu.CompilerParams(
            dimension_semantics=("parallel",),        # megacore-shard batch on v7x
            vmem_limit_bytes=32 * 1024 * 1024,
        ),
        cost_estimate=pl.CostEstimate(
            flops=flops,
            transcendentals=transcendentals,
            bytes_accessed=bytes_accessed,
        ),
    )(x_p, w0t, b0r, wrt, brr)

    if nex_p != nex:
        out = out[:nex]
    return out


def resnn_reference(x, w0, b0, wr, br, nTh):
    h = 1.0 / (nTh - 1)
    u = _antideriv_tanh(x @ w0.T + b0)
    for i in range(nTh - 1):
        u = u + h * _antideriv_tanh(u @ wr[i].T + br[i])
    return u


if __name__ == "__main__":
    # Small shapes consistent with the module: d=3 -> input dim d+1=4, m=128, nTh=3.
    d, m, nTh = 3, 128, 3

    key = jax.random.PRNGKey(0)
    k_x, k_w0, k_b0, k_w1, k_b1, k_x2 = jax.random.split(key, 6)

    # Deterministic parameter init (PyTorch-Linear-style uniform bounds).
    bound0 = 1.0 / jnp.sqrt(d + 1.0)
    w0 = jax.random.uniform(k_w0, (m, d + 1), minval=-bound0, maxval=bound0)
    b0 = jax.random.uniform(k_b0, (m,), minval=-bound0, maxval=bound0)

    bound1 = 1.0 / jnp.sqrt(float(m))
    w1 = jax.random.uniform(k_w1, (m, m), minval=-bound1, maxval=bound1)
    b1 = jax.random.uniform(k_b1, (m,), minval=-bound1, maxval=bound1)

    # Layers 2..nTh-1 are deepcopies of layer 1 in the PyTorch module.
    wr = jnp.stack([w1] * (nTh - 1), axis=0)   # (nTh-1, m, m)
    br = jnp.stack([b1] * (nTh - 1), axis=0)   # (nTh-1, m)

    # Case 1: sublane-aligned batch.
    nex = 16
    x = jax.random.normal(k_x, (nex, d + 1), dtype=jnp.float32)
    out = jax.block_until_ready(resnn_forward(x, w0, b0, wr, br, nTh))
    ref = resnn_reference(x, w0, b0, wr, br, nTh)
    assert out.shape == (nex, m)
    assert jnp.allclose(out, ref, atol=1e-5, rtol=1e-5)

    # Case 2: ragged batch (exercises the pad-and-slice path).
    nex2 = 20
    x2 = jax.random.normal(k_x2, (nex2, d + 1), dtype=jnp.float32)
    out2 = jax.block_until_ready(resnn_forward(x2, w0, b0, wr, br, nTh))
    ref2 = resnn_reference(x2, w0, b0, wr, br, nTh)
    assert out2.shape == (nex2, m)
    assert jnp.allclose(out2, ref2, atol=1e-5, rtol=1e-5)

    print("KERNEL_OK")
</pallas_src>

<mosaic_0001>
module attributes {stable_mosaic.version = 11 : i64} {
  func.func @_resnn_kernel(%arg0: i32, %arg1: memref<16x4xf32, #tpu.memory_space<vmem>>, %arg2: memref<4x128xf32, #tpu.memory_space<vmem>>, %arg3: memref<1x128xf32, #tpu.memory_space<vmem>>, %arg4: memref<2x128x128xf32, #tpu.memory_space<vmem>>, %arg5: memref<2x1x128xf32, #tpu.memory_space<vmem>>, %arg6: memref<16x128xf32, #tpu.memory_space<vmem>>) attributes {dimension_semantics = [#tpu.dimension_semantics<parallel>], iteration_bounds = array<i64: 1>, scalar_prefetch = 0 : i64, scratch_operands = 0 : i64, tpu.core_type = #tpu.core_type<tc>, window_params = [{transform_indices = @transform_0, window_bounds = array<i64: 16, 4>}, {pipeline_mode = #tpu.pipeline_mode<synchronous>, transform_indices = @transform_1, window_bounds = array<i64: 4, 128>}, {pipeline_mode = #tpu.pipeline_mode<synchronous>, transform_indices = @transform_2, window_bounds = array<i64: 1, 128>}, {pipeline_mode = #tpu.pipeline_mode<synchronous>, transform_indices = @transform_3, window_bounds = array<i64: 2, 128, 128>}, {pipeline_mode = #tpu.pipeline_mode<synchronous>, transform_indices = @transform_4, window_bounds = array<i64: 2, 1, 128>}, {transform_indices = @transform_5, window_bounds = array<i64: 16, 128>}]} {
    %c0 = arith.constant 0 : index
    %c0_0 = arith.constant 0 : index
    %0 = vector.load %arg1[%c0, %c0_0] : memref<16x4xf32, #tpu.memory_space<vmem>>, vector<16x4xf32>
    %c0_1 = arith.constant 0 : index
    %c0_2 = arith.constant 0 : index
    %1 = vector.load %arg2[%c0_1, %c0_2] : memref<4x128xf32, #tpu.memory_space<vmem>>, vector<4x128xf32>
    %cst = arith.constant dense<0.000000e+00> : vector<16x128xf32>
    %2 = tpu.matmul %0, %1, %cst {dimension_numbers = #tpu.dot_dimension_numbers<[1], [0], [0], [1], [0, 0, 1, 1], [], []>} : vector<16x4xf32>, vector<4x128xf32>, vector<16x128xf32> -> vector<16x128xf32>
    %c0_3 = arith.constant 0 : index
    %c0_4 = arith.constant 0 : index
    %3 = vector.load %arg3[%c0_3, %c0_4] : memref<1x128xf32, #tpu.memory_space<vmem>>, vector<1x128xf32>
    %4 = vector.broadcast %3 : vector<1x128xf32> to vector<16x128xf32>
    %5 = arith.addf %2, %4 : vector<16x128xf32>
    %6 = math.absf %5 : vector<16x128xf32>
    %cst_5 = arith.constant -2.000000e+00 : f32
    %7 = vector.broadcast %cst_5 : f32 to vector<16x128xf32>
    %8 = arith.mulf %7, %6 : vector<16x128xf32>
    %9 = math.exp %8 : vector<16x128xf32>
    %10 = math.log1p %9 : vector<16x128xf32>
    %11 = arith.addf %6, %10 : vector<16x128xf32>
    %c0_6 = arith.constant 0 : index
    %c0_7 = arith.constant 0 : index
    %c0_8 = arith.constant 0 : index
    %12 = vector.load %arg4[%c0_6, %c0_7, %c0_8] : memref<2x128x128xf32, #tpu.memory_space<vmem>>, vector<1x128x128xf32>
    %13 = vector.shape_cast %12 : vector<1x128x128xf32> to vector<128x128xf32>
    %cst_9 = arith.constant dense<0.000000e+00> : vector<16x128xf32>
    %14 = tpu.matmul %11, %13, %cst_9 {dimension_numbers = #tpu.dot_dimension_numbers<[1], [0], [0], [1], [0, 0, 1, 1], [], []>} : vector<16x128xf32>, vector<128x128xf32>, vector<16x128xf32> -> vector<16x128xf32>
    %c0_10 = arith.constant 0 : index
    %c0_11 = arith.constant 0 : index
    %c0_12 = arith.constant 0 : index
    %15 = vector.load %arg5[%c0_10, %c0_11, %c0_12] : memref<2x1x128xf32, #tpu.memory_space<vmem>>, vector<1x1x128xf32>
    %16 = vector.shape_cast %15 : vector<1x1x128xf32> to vector<1x128xf32>
    %17 = vector.broadcast %16 : vector<1x128xf32> to vector<16x128xf32>
    %18 = arith.addf %14, %17 : vector<16x128xf32>
    %19 = math.absf %18 : vector<16x128xf32>
    %cst_13 = arith.constant -2.000000e+00 : f32
    %20 = vector.broadcast %cst_13 : f32 to vector<16x128xf32>
    %21 = arith.mulf %20, %19 : vector<16x128xf32>
    %22 = math.exp %21 : vector<16x128xf32>
    %23 = math.log1p %22 : vector<16x128xf32>
    %24 = arith.addf %19, %23 : vector<16x128xf32>
    %cst_14 = arith.constant 5.000000e-01 : f32
    %25 = vector.broadcast %cst_14 : f32 to vector<16x128xf32>
    %26 = arith.mulf %25, %24 : vector<16x128xf32>
    %27 = arith.addf %11, %26 : vector<16x128xf32>
    %c1 = arith.constant 1 : index
    %c0_15 = arith.constant 0 : index
    %c0_16 = arith.constant 0 : index
    %28 = vector.load %arg4[%c1, %c0_15, %c0_16] : memref<2x128x128xf32, #tpu.memory_space<vmem>>, vector<1x128x128xf32>
    %29 = vector.shape_cast %28 : vector<1x128x128xf32> to vector<128x128xf32>
    %cst_17 = arith.constant dense<0.000000e+00> : vector<16x128xf32>
    %30 = tpu.matmul %27, %29, %cst_17 {dimension_numbers = #tpu.dot_dimension_numbers<[1], [0], [0], [1], [0, 0, 1, 1], [], []>} : vector<16x128xf32>, vector<128x128xf32>, vector<16x128xf32> -> vector<16x128xf32>
    %c1_18 = arith.constant 1 : index
    %c0_19 = arith.constant 0 : index
    %c0_20 = arith.constant 0 : index
    %31 = vector.load %arg5[%c1_18, %c0_19, %c0_20] : memref<2x1x128xf32, #tpu.memory_space<vmem>>, vector<1x1x128xf32>
    %32 = vector.shape_cast %31 : vector<1x1x128xf32> to vector<1x128xf32>
    %33 = vector.broadcast %32 : vector<1x128xf32> to vector<16x128xf32>
    %34 = arith.addf %30, %33 : vector<16x128xf32>
    %35 = math.absf %34 : vector<16x128xf32>
    %cst_21 = arith.constant -2.000000e+00 : f32
    %36 = vector.broadcast %cst_21 : f32 to vector<16x128xf32>
    %37 = arith.mulf %36, %35 : vector<16x128xf32>
    %38 = math.exp %37 : vector<16x128xf32>
    %39 = math.log1p %38 : vector<16x128xf32>
    %40 = arith.addf %35, %39 : vector<16x128xf32>
    %cst_22 = arith.constant 5.000000e-01 : f32
    %41 = vector.broadcast %cst_22 : f32 to vector<16x128xf32>
    %42 = arith.mulf %41, %40 : vector<16x128xf32>
    %43 = arith.addf %27, %42 : vector<16x128xf32>
    %c0_23 = arith.constant 0 : index
    %c0_24 = arith.constant 0 : index
    %44 = vector.load %arg6[%c0_23, %c0_24] : memref<16x128xf32, #tpu.memory_space<vmem>>, vector<16x128xf32>
    tpu.vector_store %arg6[%c0_23, %c0_24], %43 {strides = array<i32>} : memref<16x128xf32, #tpu.memory_space<vmem>>, vector<16x128xf32>,
    return
  }
  func.func @transform_0(%arg0: i32) -> (i32, i32) {
    %c0_i32 = arith.constant 0 : i32
    %c0_i32_0 = arith.constant 0 : i32
    return %arg0, %c0_i32 : i32, i32
  }
  func.func @transform_1(%arg0: i32) -> (i32, i32) {
    %c0_i32 = arith.constant 0 : i32
    %c0_i32_0 = arith.constant 0 : i32
    %c0_i32_1 = arith.constant 0 : i32
    return %c0_i32, %c0_i32_0 : i32, i32
  }
  func.func @transform_2(%arg0: i32) -> (i32, i32) {
    %c0_i32 = arith.constant 0 : i32
    %c0_i32_0 = arith.constant 0 : i32
    %c0_i32_1 = arith.constant 0 : i32
    return %c0_i32, %c0_i32_0 : i32, i32
  }
  func.func @transform_3(%arg0: i32) -> (i32, i32, i32) {
    %c0_i32 = arith.constant 0 : i32
    %c0_i32_0 = arith.constant 0 : i32
    %c0_i32_1 = arith.constant 0 : i32
    %c0_i32_2 = arith.constant 0 : i32
    return %c0_i32, %c0_i32_0, %c0_i32_1 : i32, i32, i32
  }
  func.func @transform_4(%arg0: i32) -> (i32, i32, i32) {
    %c0_i32 = arith.constant 0 : i32
    %c0_i32_0 = arith.constant 0 : i32
    %c0_i32_1 = arith.constant 0 : i32
    %c0_i32_2 = arith.constant 0 : i32
    return %c0_i32, %c0_i32_0, %c0_i32_1 : i32, i32, i32
  }
  func.func @transform_5(%arg0: i32) -> (i32, i32) {
    %c0_i32 = arith.constant 0 : i32
    %c0_i32_0 = arith.constant 0 : i32
    return %arg0, %c0_i32 : i32, i32
  }
}

</mosaic_0001>

<bundles_post_ra>
// kernel: tpu_custom_call.1
= control target key start
LH: loop header
LB: loop body
LE: loop exit
PB: predicated region body
PF: predicated region fallthrough
CT: control target
= control target key end

     0   :  { %10 = vsyncpa [#allocation3], 0  ;;  %s470_s0 = inlined_call_operand.vmem [shape: f32[16,4], index: 0, kind: input, shape index: {}]   ;;  %s471_s1 = inlined_call_operand.vmem [shape: f32[4,128], index: 1, kind: input, shape index: {}]   ;;  %s472_s2 = inlined_call_operand.vmem [shape: f32[1,128], index: 2, kind: input, shape index: {}]   ;;  %s473_s3 = inlined_call_operand.hbm [shape: f32[2,128,128], index: 3, kind: input, shape index: {}]   ;;  %s474_s4 = inlined_call_operand.vmem [shape: f32[2,1,128], index: 4, kind: input, shape index: {}]   ;;  %s475_s5 = inlined_call_operand.hbm [shape: f32[16,128], index: 5, kind: output, shape index: {}]  }
   0x1   :  { %11 = vsyncpa [#allocation4], 0  ;;  %s22_s20 = sshll.u32 %s473_s3, 4  ;;  %s398_s21 = smov [#allocation2]   ;;  %s23_s20 = int_to_ptr.hbm [resolvable:$true] %s22_s20 }
   0x2   :  { %s24_s22 = sshll.u32 %s398_s21, 4  ;;  %s399_s23 = smov 128   ;;  %s25_s22 = int_to_ptr.vmem [resolvable:$true] %s24_s22 }
   0x3   :  { %s400_s24 = smov 8  }
   0x4   :  { %30 = dma.hbm_to_vmem [thread:$0]  %s23_s20, 4096, %s25_s22, [#allocation3], %s399_s23, %s399_s23, %s400_s24  }
   0x5   :  { %394 = dma.done.wait [#allocation3], 4096  }
   0x6   :  { %395 = vsyncadd [#allocation3], 4294963200  ;;  %vm51_vm0 = vcmask 1043456   ;;  %vm44_vm1 = vcmask 31744   ;;  %v39_v0 = vld [vmem:[%s471_s1] sm:$0xf] }
   0x7   :  { %v37_v1 = vld [vmem:[%s470_s0] sm:$0xff]  ;;  %279 = vmatpush.msk.msra.mxu0 %vm51_vm0, %v39_v0  ;;  %v121_v2 = vld [vmem:[#allocation2 + $0x78] sm:$0xff]  ;;  %v38_v3 = vld [vmem:[%s470_s0 + $0x8] sm:$0xff]  ;;  %s266_s11 = sshll.u32 %s475_s5, 4  ;;  %s267_s11 = int_to_ptr.hbm [resolvable:$true] %s266_s11 }
   0x8   :  { %280 = vmatmul.msk.f32.vlgmr.msra.gmra.mxu0 %vm44_vm1, %v37_v1  ;;  %126 = vmatpush.msra.mxu1 %v121_v2  ;;  %v120_v4 = vld [vmem:[#allocation2 + $0x70] sm:$0xff]  ;;  %v119_v5 = vld [vmem:[#allocation2 + $0x68] sm:$0xff]  ;;  %v118_v6 = vld [vmem:[#allocation2 + $0x60] sm:$0xff] }
   0x9   :  { %283 = vmatpush.msra.mxu3 %v121_v2  ;;  %v117_v7 = vld [vmem:[#allocation2 + $0x58] sm:$0xff]  ;;  %v116_v8 = vld [vmem:[#allocation2 + $0x50] sm:$0xff]  ;;  %v115_v9 = vld [vmem:[#allocation2 + $0x48] sm:$0xff] }
   0xa   :  { %127 = vmatpush.msra.mxu1 %v120_v4  ;;  %v114_v10 = vld [vmem:[#allocation2 + $0x40] sm:$0xff]  ;;  %v113_v11 = vld [vmem:[#allocation2 + $0x38] sm:$0xff]  ;;  %v112_v12 = vld [vmem:[#allocation2 + $0x30] sm:$0xff] }
   0xb   :  { %284 = vmatpush.msra.mxu3 %v120_v4  ;;  %v111_v13 = vld [vmem:[#allocation2 + $0x28] sm:$0xff]  ;;  %v110_v14 = vld [vmem:[#allocation2 + $0x20] sm:$0xff]  ;;  %v109_v15 = vld [vmem:[#allocation2 + $0x18] sm:$0xff] }
   0xc   :  { %128 = vmatpush.msra.mxu1 %v119_v5  ;;  %v108_v16 = vld [vmem:[#allocation2 + $0x10] sm:$0xff]  ;;  %v107_v17 = vld [vmem:[#allocation2 + $0x8] sm:$0xff]  ;;  %v106_v18 = vld [vmem:[#allocation2] sm:$0xff] }
   0xd   :  { %285 = vmatpush.msra.mxu3 %v119_v5  ;;  %v319_v19 = vld [vmem:[%s472_s2] ss:$0 sm:$0xff]  ;;  %v197_v50 = vld [vmem:[#allocation2 + $0xf8] sm:$0xff]  ;;  %v196_v51 = vld [vmem:[#allocation2 + $0xf0] sm:$0xff] }
   0xe   :  { %129 = vmatpush.msra.mxu1 %v118_v6  ;;  %203 = vmatpush.msrb.mxu0 %v197_v50  ;;  %v195_v52 = vld [vmem:[#allocation2 + $0xe8] sm:$0xff]  ;;  %v194_v53 = vld [vmem:[#allocation2 + $0xe0] sm:$0xff]  ;;  %v193_v54 = vld [vmem:[#allocation2 + $0xd8] sm:$0xff] }
   0xf   :  { %286 = vmatpush.msra.mxu3 %v118_v6  ;;  %299 = vmatpush.msra.mxu2 %v197_v50  ;;  %v192_v55 = vld [vmem:[#allocation2 + $0xd0] sm:$0xff]  ;;  %v191_v56 = vld [vmem:[#allocation2 + $0xc8] sm:$0xff]  ;;  %v190_v57 = vld [vmem:[#allocation2 + $0xc0] sm:$0xff] }
  0x10   :  { %281 = vmatmul.msk.f32.gmra.mxu0 %vm44_vm1, %v38_v3  ;;  %130 = vmatpush.msra.mxu1 %v117_v7  ;;  %v189_v58 = vld [vmem:[#allocation2 + $0xb8] sm:$0xff]  ;;  %v188_v59 = vld [vmem:[#allocation2 + $0xb0] sm:$0xff]  ;;  %v187_v60 = vld [vmem:[#allocation2 + $0xa8] sm:$0xff] }
  0x11   :  { %287 = vmatpush.msra.mxu3 %v117_v7  ;;  %204 = vmatpush.msrb.mxu0 %v196_v51  ;;  %v186_v61 = vld [vmem:[#allocation2 + $0xa0] sm:$0xff]  ;;  %v185_v62 = vld [vmem:[#allocation2 + $0x98] sm:$0xff]  ;;  %v184_v63 = vld [vmem:[#allocation2 + $0x90] sm:$0xff] }
  0x12   :  { %131 = vmatpush.msra.mxu1 %v116_v8  ;;  %300 = vmatpush.msra.mxu2 %v196_v51  ;;  %v320_v0 = vld [vmem:[%s474_s4] ss:$0 sm:$0xff]  ;;  %v183_v1 = vld [vmem:[#allocation2 + $0x88] sm:$0xff] }
  0x13   :  { %288 = vmatpush.msra.mxu3 %v116_v8  ;;  %205 = vmatpush.msrb.mxu0 %v195_v52  ;;  %v182_v3 = vld [vmem:[#allocation2 + $0x80] sm:$0xff] }
  0x14   :  { %132 = vmatpush.msra.mxu1 %v115_v9  ;;  %301 = vmatpush.msra.mxu2 %v195_v52 }
  0x15   :  { %289 = vmatpush.msra.mxu3 %v115_v9  ;;  %206 = vmatpush.msrb.mxu0 %v194_v53 }
  0x16   :  { %133 = vmatpush.msra.mxu1 %v114_v10  ;;  %302 = vmatpush.msra.mxu2 %v194_v53 }
  0x17   :  { %290 = vmatpush.msra.mxu3 %v114_v10  ;;  %207 = vmatpush.msrb.mxu0 %v193_v54 }
  0x18   :  { %134 = vmatpush.msra.mxu1 %v113_v11  ;;  %303 = vmatpush.msra.mxu2 %v193_v54 }
  0x19   :  { %291 = vmatpush.msra.mxu3 %v113_v11  ;;  %208 = vmatpush.msrb.mxu0 %v192_v55 }
  0x1a   :  { %135 = vmatpush.msra.mxu1 %v112_v12  ;;  %304 = vmatpush.msra.mxu2 %v192_v55 }
  0x1b   :  { %292 = vmatpush.msra.mxu3 %v112_v12  ;;  %209 = vmatpush.msrb.mxu0 %v191_v56 }
  0x1c   :  { %136 = vmatpush.msra.mxu1 %v111_v13  ;;  %305 = vmatpush.msra.mxu2 %v191_v56 }
  0x1d   :  { %293 = vmatpush.msra.mxu3 %v111_v13  ;;  %210 = vmatpush.msrb.mxu0 %v190_v57 }
  0x1e   :  { %137 = vmatpush.msra.mxu1 %v110_v14  ;;  %306 = vmatpush.msra.mxu2 %v190_v57 }
  0x1f   :  { %294 = vmatpush.msra.mxu3 %v110_v14  ;;  %211 = vmatpush.msrb.mxu0 %v189_v58 }
  0x20   :  { %138 = vmatpush.msra.mxu1 %v109_v15  ;;  %307 = vmatpush.msra.mxu2 %v189_v58 }
  0x21   :  { %295 = vmatpush.msra.mxu3 %v109_v15  ;;  %212 = vmatpush.msrb.mxu0 %v188_v59 }
  0x22   :  { %139 = vmatpush.msra.mxu1 %v108_v16  ;;  %308 = vmatpush.msra.mxu2 %v188_v59 }
  0x23   :  { %296 = vmatpush.msra.mxu3 %v108_v16  ;;  %213 = vmatpush.msrb.mxu0 %v187_v60 }
  0x24   :  { %140 = vmatpush.msra.mxu1 %v107_v17  ;;  %309 = vmatpush.msra.mxu2 %v187_v60 }
  0x25   :  { %297 = vmatpush.msra.mxu3 %v107_v17  ;;  %214 = vmatpush.msrb.mxu0 %v186_v61 }
  0x26   :  { %141 = vmatpush.msra.mxu1 %v106_v18  ;;  %310 = vmatpush.msra.mxu2 %v186_v61 }
  0x27   :  { %298 = vmatpush.msra.mxu3 %v106_v18  ;;  %215 = vmatpush.msrb.mxu0 %v185_v62 }
  0x28   :  { %311 = vmatpush.msra.mxu2 %v185_v62 }
  0x29   :  { %216 = vmatpush.msrb.mxu0 %v184_v63 }
  0x2a   :  { %312 = vmatpush.msra.mxu2 %v184_v63 }
  0x2b   :  { %217 = vmatpush.msrb.mxu0 %v183_v1 }
  0x2c   :  { %313 = vmatpush.msra.mxu2 %v183_v1 }
  0x2d   :  { %218 = vmatpush.msrb.mxu0 %v182_v3 }
  0x2e   :  { %314 = vmatpush.msra.mxu2 %v182_v3 }
  0x85   :  { %v72_v20 = vpop.f32.mrf.mxu0 }
  0x86   :  { %v73_v21 = vadd.f32 %v319_v19, %v72_v20 }
  0x88   :  { %v78_v22 = vand.u32 2147483647, %v73_v21 }
  0x8a   :  { %v80_v23 = vmul.f32 -2.0, %v78_v22 }
  0x8c   :  { %v82_v24 = vmul.f32 1.442695, %v80_v23 }
  0x8d   :  { %v75_v25 = vpop.f32.mrf.mxu0 }
  0x8e   :  { %322 = vpow2.f32 %v82_v24  ;;  %v76_v26 = vadd.f32 %v319_v19, %v75_v25 }
  0x90   :  { %v79_v27 = vand.u32 2147483647, %v76_v26 }
  0x92   :  { %v81_v28 = vmul.f32 -2.0, %v79_v27 }
  0x94   :  { %v323_v29 = vpop.eup %322  ;;  %v84_v30 = vmul.f32 1.442695, %v81_v28 }
  0x95   :  { %v86_v31 = vadd.f32 1.0, %v323_v29  ;;  %v89_v32 = vmul.f32 -0.5, %v323_v29  ;;  %v92_v34 = vand.u32 2147483647, %v323_v29 }
  0x96   :  { %324 = vpow2.f32 %v84_v30 }
  0x97   :  { %326 = vlog2.f32 %v86_v31  ;;  %v90_v33 = vadd.f32 1.0, %v89_v32  ;;  %vm93_vm2 = vcmp.lt.f32.partialorder %v92_v34, 0.0004427343 }
  0x99   :  { %v91_v39 = vmul.f32 %v323_v29, %v90_v33 }
  0x9c   :  { %v325_v35 = vpop.eup %324 }
  0x9d   :  { %v327_v36 = vpop.eup %326  ;;  %v95_v37 = vadd.f32 1.0, %v325_v35  ;;  %v98_v40 = vmul.f32 -0.5, %v325_v35  ;;  %v101_v44 = vand.u32 2147483647, %v325_v35 }
  0x9e   :  { %v88_v38 = vmul.f32 0.6931472, %v327_v36 }
  0x9f   :  { %328 = vlog2.f32 %v95_v37  ;;  %v99_v43 = vadd.f32 1.0, %v98_v40  ;;  %vm102_vm3 = vcmp.lt.f32.partialorder %v101_v44, 0.0004427343  ;;  %v321_v37 = vld [vmem:[%s474_s4 + $0x1] ss:$0 sm:$0xff]  ;;  %s401_s4 = smov [#allocation5]  }
  0xa0   :  { %v94_v41 = vsel %vm93_vm2, %v91_v39, %v88_v38  ;;  %s264_s8 = sshll.u32 %s401_s4, 4  ;;  %s265_s8 = int_to_ptr.vmem [resolvable:$true] %s264_s8 }
  0xa1   :  { %v450_v42 = vadd.f32 %v94_v41, %v78_v22  ;;  %v100_v47 = vmul.f32 %v325_v35, %v99_v43 }
  0xa3   :  { %142 = vmatmul.f32.vlgmr.msra.gmra.mxu1 %v450_v42 }
  0xa5   :  { %v329_v45 = vpop.eup %328 }
  0xa6   :  { %v97_v46 = vmul.f32 0.6931472, %v329_v45 }
  0xa8   :  { %v103_v48 = vsel %vm102_vm3, %v100_v47, %v97_v46 }
  0xa9   :  { %v453_v49 = vadd.f32 %v103_v48, %v79_v27 }
  0xab   :  { %145 = vmatmul.f32.vlgmr.msra.gmra.mxu3 %v453_v49 }
 0x120   :  { %v143_v2 = vpop.f32.mrf.mxu1 }
 0x121   :  { %v144_v4 = vadd.f32 %v320_v0, %v143_v2 }
 0x123   :  { %v149_v5 = vand.u32 2147483647, %v144_v4 }
 0x125   :  { %v151_v6 = vmul.f32 -2.0, %v149_v5 }
 0x127   :  { %v153_v7 = vmul.f32 1.442695, %v151_v6 }
 0x129   :  { %330 = vpow2.f32 %v153_v7 }
 0x12e   :  { %v146_v8 = vpop.f32.mrf.mxu3 }
 0x12f   :  { %v331_v9 = vpop.eup %330  ;;  %v147_v10 = vadd.f32 %v320_v0, %v146_v8 }
 0x130   :  { %v157_v11 = vadd.f32 1.0, %v331_v9  ;;  %v160_v12 = vmul.f32 -0.5, %v331_v9  ;;  %v163_v17 = vand.u32 2147483647, %v331_v9 }
 0x131   :  { %v150_v13 = vand.u32 2147483647, %v147_v10 }
 0x132   :  { %332 = vlog2.f32 %v157_v11  ;;  %v161_v15 = vadd.f32 1.0, %v160_v12  ;;  %vm164_vm4 = vcmp.lt.f32.partialorder %v163_v17, 0.0004427343 }
 0x133   :  { %v152_v14 = vmul.f32 -2.0, %v150_v13 }
 0x134   :  { %v162_v20 = vmul.f32 %v331_v9, %v161_v15 }
 0x135   :  { %v155_v16 = vmul.f32 1.442695, %v152_v14 }
 0x137   :  { %334 = vpow2.f32 %v155_v16 }
 0x138   :  { %v333_v18 = vpop.eup %332 }
 0x139   :  { %v159_v19 = vmul.f32 0.6931472, %v333_v18 }
 0x13b   :  { %v165_v21 = vsel %vm164_vm4, %v162_v20, %v159_v19 }
 0x13c   :  { %v175_v22 = vadd.f32 %v165_v21, %v149_v5 }
 0x13d   :  { %v335_v23 = vpop.eup %334 }
 0x13e   :  { %v177_v24 = vmul.f32 0.5, %v175_v22  ;;  %v166_v25 = vadd.f32 1.0, %v335_v23  ;;  %v169_v26 = vmul.f32 -0.5, %v335_v23  ;;  %v172_v29 = vand.u32 2147483647, %v335_v23 }
 0x140   :  { %336 = vlog2.f32 %v166_v25  ;;  %v179_v27 = vadd.f32 %v177_v24, %v450_v42  ;;  %v170_v28 = vadd.f32 1.0, %v169_v26  ;;  %vm173_vm5 = vcmp.lt.f32.partialorder %v172_v29, 0.0004427343 }
 0x142   :  { %219 = vmatmul.f32.vlgmr.msrb.gmra.mxu0 %v179_v27  ;;  %v171_v32 = vmul.f32 %v335_v23, %v170_v28 }
 0x146   :  { %v337_v30 = vpop.eup %336 }
 0x147   :  { %v168_v31 = vmul.f32 0.6931472, %v337_v30 }
 0x149   :  { %v174_v33 = vsel %vm173_vm5, %v171_v32, %v168_v31 }
 0x14a   :  { %v176_v34 = vadd.f32 %v174_v33, %v150_v13 }
 0x14c   :  { %v178_v35 = vmul.f32 0.5, %v176_v34 }
 0x14e   :  { %v180_v36 = vadd.f32 %v178_v35, %v453_v49 }
 0x150   :  { %222 = vmatmul.f32.vlgmr.msra.gmra.mxu2 %v180_v36 }
 0x1bf   :  { %v220_v38 = vpop.f32.mrf.mxu0 }
 0x1c0   :  { %v221_v39 = vadd.f32 %v321_v37, %v220_v38 }
 0x1c2   :  { %v226_v40 = vand.u32 2147483647, %v221_v39 }
 0x1c4   :  { %v228_v41 = vmul.f32 -2.0, %v226_v40 }
 0x1c6   :  { %v230_v42 = vmul.f32 1.442695, %v228_v41 }
 0x1c8   :  { %338 = vpow2.f32 %v230_v42 }
 0x1ce   :  { %v339_v43 = vpop.eup %338 }
 0x1cf   :  { %v234_v44 = vadd.f32 1.0, %v339_v43  ;;  %v237_v45 = vmul.f32 -0.5, %v339_v43  ;;  %v240_v50 = vand.u32 2147483647, %v339_v43 }
 0x1d1   :  { %340 = vlog2.f32 %v234_v44  ;;  %v238_v47 = vadd.f32 1.0, %v237_v45  ;;  %vm241_vm6 = vcmp.lt.f32.partialorder %v240_v50, 0.0004427343 }
 0x1d3   :  { %v223_v46 = vpop.f32.mrf.mxu2  ;;  %v239_v53 = vmul.f32 %v339_v43, %v238_v47 }
 0x1d4   :  { %v224_v48 = vadd.f32 %v321_v37, %v223_v46 }
 0x1d6   :  { %v227_v49 = vand.u32 2147483647, %v224_v48 }
 0x1d7   :  { %v341_v51 = vpop.eup %340 }
 0x1d8   :  { %v236_v52 = vmul.f32 0.6931472, %v341_v51  ;;  %v229_v54 = vmul.f32 -2.0, %v227_v49 }
 0x1da   :  { %v242_v55 = vsel %vm241_vm6, %v239_v53, %v236_v52  ;;  %v232_v56 = vmul.f32 1.442695, %v229_v54 }
 0x1db   :  { %v252_v57 = vadd.f32 %v242_v55, %v226_v40 }
 0x1dc   :  { %342 = vpow2.f32 %v232_v56 }
 0x1dd   :  { %v254_v58 = vmul.f32 0.5, %v252_v57 }
 0x1df   :  { %v256_v59 = vadd.f32 %v254_v58, %v179_v27 }
 0x1e1   :  { %258 = vst [vmem:[#allocation5] sm:$0xff] %v256_v59 }
 0x1e2   :  { %v343_v60 = vpop.eup %342 }
 0x1e3   :  { %v243_v61 = vadd.f32 1.0, %v343_v60  ;;  %v246_v62 = vmul.f32 -0.5, %v343_v60  ;;  %v249_v0 = vand.u32 2147483647, %v343_v60 }
 0x1e5   :  { %344 = vlog2.f32 %v243_v61  ;;  %v247_v63 = vadd.f32 1.0, %v246_v62  ;;  %vm250_vm7 = vcmp.lt.f32.partialorder %v249_v0, 0.0004427343 }
 0x1e7   :  { %v248_v3 = vmul.f32 %v343_v60, %v247_v63 }
 0x1eb   :  { %v345_v1 = vpop.eup %344 }
 0x1ec   :  { %v245_v2 = vmul.f32 0.6931472, %v345_v1 }
 0x1ee   :  { %v251_v4 = vsel %vm250_vm7, %v248_v3, %v245_v2 }
 0x1ef   :  { %v253_v5 = vadd.f32 %v251_v4, %v227_v49 }
 0x1f1   :  { %v255_v6 = vmul.f32 0.5, %v253_v5 }
 0x1f3   :  { %v257_v7 = vadd.f32 %v255_v6, %v180_v36 }
 0x1f5   :  { %259 = vst [vmem:[#allocation5 + $0x8] sm:$0xff] %v257_v7 }
 0x1f6   :  { %272 = dma.vmem_to_hbm [thread:$0]  %s265_s8, 256, %s267_s11, [#allocation4], %s399_s23, %s399_s23, %s400_s24  }
 0x1f7   :  { %396 = dma.done.wait [#allocation4], 256  }
 0x1f8   :  { %397 = vsyncadd [#allocation4], 4294967040 }
 0x1f9   :  { %277 = vsyncpa [#allocation3], 1 }
 0x1fa   :  { %278 = vsyncpa [#allocation4], 1 }

</bundles_post_ra>
